<compile_context>
chip_gen: v5e
topology: v5e:2x2
jax: 0.10.0
libtpu: 0.0.40
codegen_flags: <defaults>
</compile_context>

<pallas_src>
import numpy as np
import jax
import jax.numpy as jnp
from jax.experimental import pallas as pl
from jax.experimental.pallas import tpu as pltpu


def decoder_lstm_kernel(x_ref, wih_ref, whh_ref, b_ref, wout_ref, bout_ref,
                        out_ref, hs_ref):
    """Single invocation: full LSTM recurrence + fused output projection.

    x_ref   : (S, B, I)   time-major inputs
    wih_ref : (I, 4H)     W_ih^T  (pre-transposed on host)
    whh_ref : (H, 4H)     W_hh^T  (pre-transposed on host)
    b_ref   : (1, 4H)     b_ih + b_hh
    wout_ref: (H, V)      W_out^T (pre-transposed on host)
    bout_ref: (1, V)
    out_ref : (S, B, V)   logits (time-major)
    hs_ref  : (S, B, H)   VMEM scratch for hidden states
    """
    S, B, I = x_ref.shape
    H = whh_ref.shape[0]
    V = wout_ref.shape[1]

    # Batched input projection for all S time steps (recurrence-independent):
    # one (S*B, I) @ (I, 4H) MXU pass instead of S tiny ones.
    x_all = x_ref[...].reshape(S * B, I)
    gx = (jnp.dot(x_all, wih_ref[...], preferred_element_type=jnp.float32)
          + b_ref[...]).reshape(S, B, 4 * H)

    whh = whh_ref[...]  # (H, 4H)

    # Fully-unrolled recurrence; S is a trace-time constant, indices are static,
    # h/c stay in vregs across iterations (no per-step VMEM load/store).
    h = jnp.zeros((B, H), jnp.float32)
    c = jnp.zeros((B, H), jnp.float32)
    for t in range(S):
        gates = gx[t] + jnp.dot(h, whh, preferred_element_type=jnp.float32)
        i_g = jax.nn.sigmoid(gates[:, 0 * H:1 * H])
        f_g = jax.nn.sigmoid(gates[:, 1 * H:2 * H])
        g_g = jnp.tanh(gates[:, 2 * H:3 * H])
        o_g = jax.nn.sigmoid(gates[:, 3 * H:4 * H])
        c = f_g * c + i_g * g_g
        h = o_g * jnp.tanh(c)
        hs_ref[t] = h

    # Hoisted output projection: one batched matmul + one full-extent store.
    hs = hs_ref[...].reshape(S * B, H)
    logits = (jnp.dot(hs, wout_ref[...], preferred_element_type=jnp.float32)
              + bout_ref[...])
    out_ref[...] = logits.reshape(S, B, V)


def decoder_rnn_forward(features, captions, lengths, embed_w,
                        w_ih, w_hh, b_ih, b_hh, w_out, b_out,
                        external_features=None):
    """DecoderRNN.forward with teacher_forcing='always'.

    features:           (B, E)           image feature vectors
    captions:           (B, T) int32     caption token ids
    lengths:            list/array, sorted descending, lengths[i] <= T+1
    external_features:  (B, F) or None   persist features
    Returns packed outputs (sum(lengths), vocab_size), matching
    self.linear(self.lstm(pack_padded_sequence(inputs, lengths))[0][0]).
    """
    B, E = features.shape
    # embeddings = cat([features.unsqueeze(1), embed(captions)], 1)
    emb = embed_w[captions]                                       # (B, T, E)
    embeddings = jnp.concatenate([features[:, None, :], emb], 1)  # (B, S, E)
    S = embeddings.shape[1]

    if external_features is not None:
        F = external_features.shape[-1]
        persist = jnp.broadcast_to(external_features[:, None, :], (B, S, F))
        inputs = jnp.concatenate([embeddings, persist], axis=2)   # (B, S, E+F)
    else:
        inputs = embeddings

    x_tm = jnp.transpose(inputs, (1, 0, 2)).astype(jnp.float32)   # (S, B, I)
    H = w_hh.shape[-1]
    V = w_out.shape[0]

    # Host-side (free) parameter prep: pre-transpose weights, fold biases.
    w_ih_t = jnp.transpose(w_ih).astype(jnp.float32)              # (I, 4H)
    w_hh_t = jnp.transpose(w_hh).astype(jnp.float32)              # (H, 4H)
    w_out_t = jnp.transpose(w_out).astype(jnp.float32)            # (H, V)
    b_gate = (b_ih + b_hh)[None, :].astype(jnp.float32)           # (1, 4H)
    b_o = b_out[None, :].astype(jnp.float32)                      # (1, V)

    # Single kernel invocation: no grid, every operand is one full-extent
    # VMEM-resident block; one lane-dense output writeback.
    logits_tm = pl.pallas_call(
        decoder_lstm_kernel,
        out_shape=jax.ShapeDtypeStruct((S, B, V), jnp.float32),
        scratch_shapes=[pltpu.VMEM((S, B, H), jnp.float32)],      # hidden states
    )(x_tm, w_ih_t, w_hh_t, b_gate, w_out_t, b_o)

    # pack_padded_sequence(batch_first=True) data ordering (lengths sorted desc):
    lengths_np = np.asarray(lengths)
    t_idx, b_idx = [], []
    for t in range(int(lengths_np.max())):
        for b in range(B):
            if lengths_np[b] > t:
                t_idx.append(t)
                b_idx.append(b)
    packed = logits_tm[jnp.asarray(t_idx), jnp.asarray(b_idx)]    # (sum(len), V)
    return packed


def decoder_rnn_reference(features, captions, lengths, embed_w,
                          w_ih, w_hh, b_ih, b_hh, w_out, b_out,
                          external_features=None):
    """Pure-JAX reference (lax.scan LSTM) for correctness checking."""
    B, E = features.shape
    emb = embed_w[captions]
    embeddings = jnp.concatenate([features[:, None, :], emb], 1)
    S = embeddings.shape[1]
    if external_features is not None:
        F = external_features.shape[-1]
        persist = jnp.broadcast_to(external_features[:, None, :], (B, S, F))
        inputs = jnp.concatenate([embeddings, persist], axis=2)
    else:
        inputs = embeddings
    x_tm = jnp.transpose(inputs, (1, 0, 2)).astype(jnp.float32)
    H = w_hh.shape[-1]

    def step(carry, x_t):
        h, c = carry
        gates = x_t @ w_ih.T + b_ih + h @ w_hh.T + b_hh
        i = jax.nn.sigmoid(gates[:, 0 * H:1 * H])
        f = jax.nn.sigmoid(gates[:, 1 * H:2 * H])
        g = jnp.tanh(gates[:, 2 * H:3 * H])
        o = jax.nn.sigmoid(gates[:, 3 * H:4 * H])
        c = f * c + i * g
        h = o * jnp.tanh(c)
        return (h, c), h

    h0 = jnp.zeros((B, H), jnp.float32)
    _, hs = jax.lax.scan(step, (h0, h0), x_tm)                    # (S, B, H)
    logits_tm = hs @ w_out.T + b_out

    lengths_np = np.asarray(lengths)
    t_idx, b_idx = [], []
    for t in range(int(lengths_np.max())):
        for b in range(B):
            if lengths_np[b] > t:
                t_idx.append(t)
                b_idx.append(b)
    return logits_tm[jnp.asarray(t_idx), jnp.asarray(b_idx)]


if __name__ == "__main__":
    # Hyper-parameters implied by DecoderRNN.__init__ (kept small).
    B, T = 8, 7                 # batch, caption length -> seq_length S = T+1 = 8
    vocab_size = 64
    embed_size = 32             # p.embed_size
    hidden_size = 32            # p.hidden_size
    ext_feat_dim = 16           # ext_features_dim; internal extractors = []
    input_size = embed_size + ext_feat_dim

    key = jax.random.PRNGKey(0)
    ks = jax.random.split(key, 10)

    # Deterministic parameter init.
    embed_w = 0.1 * jax.random.normal(ks[0], (vocab_size, embed_size), jnp.float32)
    w_ih = 0.1 * jax.random.normal(ks[1], (4 * hidden_size, input_size), jnp.float32)
    w_hh = 0.1 * jax.random.normal(ks[2], (4 * hidden_size, hidden_size), jnp.float32)
    b_ih = 0.1 * jax.random.normal(ks[3], (4 * hidden_size,), jnp.float32)
    b_hh = 0.1 * jax.random.normal(ks[4], (4 * hidden_size,), jnp.float32)
    w_out = 0.1 * jax.random.normal(ks[5], (vocab_size, hidden_size), jnp.float32)
    b_out = 0.1 * jax.random.normal(ks[6], (vocab_size,), jnp.float32)

    # Inputs.
    features = jax.random.normal(ks[7], (B, embed_size), jnp.float32)
    captions = jax.random.randint(ks[8], (B, T), 0, vocab_size, jnp.int32)
    external_features = jax.random.normal(ks[9], (B, ext_feat_dim), jnp.float32)
    lengths = np.array([8, 7, 7, 5, 4, 3, 2, 2], dtype=np.int32)  # sorted desc, <= T+1

    out = decoder_rnn_forward(features, captions, lengths, embed_w,
                              w_ih, w_hh, b_ih, b_hh, w_out, b_out,
                              external_features=external_features)
    out = jax.block_until_ready(out)

    ref = decoder_rnn_reference(features, captions, lengths, embed_w,
                                w_ih, w_hh, b_ih, b_hh, w_out, b_out,
                                external_features=external_features)
    ref = jax.block_until_ready(ref)

    assert out.shape == (int(lengths.sum()), vocab_size), out.shape
    np.testing.assert_allclose(np.asarray(out), np.asarray(ref), rtol=1e-4, atol=1e-4)
    print("KERNEL_OK")
</pallas_src>

<mosaic_0001>
module attributes {stable_mosaic.version = 11 : i64} {
  func.func @decoder_lstm_kernel(%arg0: memref<8x8x48xf32, #tpu.memory_space<vmem>>, %arg1: memref<48x128xf32, #tpu.memory_space<vmem>>, %arg2: memref<32x128xf32, #tpu.memory_space<vmem>>, %arg3: memref<1x128xf32, #tpu.memory_space<vmem>>, %arg4: memref<32x64xf32, #tpu.memory_space<vmem>>, %arg5: memref<1x64xf32, #tpu.memory_space<vmem>>, %arg6: memref<8x8x64xf32, #tpu.memory_space<vmem>>, %arg7: memref<8x8x32xf32, #tpu.memory_space<vmem>>) attributes {dimension_semantics = [], scalar_prefetch = 0 : i64, scratch_operands = 1 : i64, tpu.core_type = #tpu.core_type<tc>} {
    %c0 = arith.constant 0 : index
    %c0_0 = arith.constant 0 : index
    %c0_1 = arith.constant 0 : index
    %0 = vector.load %arg0[%c0, %c0_0, %c0_1] : memref<8x8x48xf32, #tpu.memory_space<vmem>>, vector<8x8x48xf32>
    %1 = vector.shape_cast %0 : vector<8x8x48xf32> to vector<64x48xf32>
    %c0_2 = arith.constant 0 : index
    %c0_3 = arith.constant 0 : index
    %2 = vector.load %arg1[%c0_2, %c0_3] : memref<48x128xf32, #tpu.memory_space<vmem>>, vector<48x128xf32>
    %cst = arith.constant dense<0.000000e+00> : vector<64x128xf32>
    %3 = tpu.matmul %1, %2, %cst {dimension_numbers = #tpu.dot_dimension_numbers<[1], [0], [0], [1], [0, 0, 1, 1], [], []>} : vector<64x48xf32>, vector<48x128xf32>, vector<64x128xf32> -> vector<64x128xf32>
    %c0_4 = arith.constant 0 : index
    %c0_5 = arith.constant 0 : index
    %4 = vector.load %arg3[%c0_4, %c0_5] : memref<1x128xf32, #tpu.memory_space<vmem>>, vector<1x128xf32>
    %5 = vector.broadcast %4 : vector<1x128xf32> to vector<64x128xf32>
    %6 = arith.addf %3, %5 : vector<64x128xf32>
    %7 = vector.shape_cast %6 : vector<64x128xf32> to vector<8x8x128xf32>
    %c0_6 = arith.constant 0 : index
    %c0_7 = arith.constant 0 : index
    %8 = vector.load %arg2[%c0_6, %c0_7] : memref<32x128xf32, #tpu.memory_space<vmem>>, vector<32x128xf32>
    %cst_8 = arith.constant 0.000000e+00 : f32
    %9 = vector.broadcast %cst_8 : f32 to vector<8x32xf32>
    %cst_9 = arith.constant 0.000000e+00 : f32
    %10 = vector.broadcast %cst_9 : f32 to vector<8x32xf32>
    %11 = vector.extract_strided_slice %7 {offsets = [0, 0, 0], sizes = [1, 8, 128], strides = [1, 1, 1]} : vector<8x8x128xf32> to vector<1x8x128xf32>
    %12 = vector.shape_cast %11 : vector<1x8x128xf32> to vector<8x128xf32>
    %cst_10 = arith.constant dense<0.000000e+00> : vector<8x128xf32>
    %13 = tpu.matmul %9, %8, %cst_10 {dimension_numbers = #tpu.dot_dimension_numbers<[1], [0], [0], [1], [0, 0, 1, 1], [], []>} : vector<8x32xf32>, vector<32x128xf32>, vector<8x128xf32> -> vector<8x128xf32>
    %14 = arith.addf %12, %13 : vector<8x128xf32>
    %15 = vector.extract_strided_slice %14 {offsets = [0, 0], sizes = [8, 32], strides = [1, 1]} : vector<8x128xf32> to vector<8x32xf32>
    %16 = arith.negf %15 : vector<8x32xf32>
    %17 = math.exp %16 : vector<8x32xf32>
    %cst_11 = arith.constant 1.000000e+00 : f32
    %18 = vector.broadcast %cst_11 : f32 to vector<8x32xf32>
    %19 = arith.addf %18, %17 : vector<8x32xf32>
    %20 = arith.divf %18, %19 : vector<8x32xf32>
    %21 = vector.extract_strided_slice %14 {offsets = [0, 32], sizes = [8, 32], strides = [1, 1]} : vector<8x128xf32> to vector<8x32xf32>
    %22 = arith.negf %21 : vector<8x32xf32>
    %23 = math.exp %22 : vector<8x32xf32>
    %cst_12 = arith.constant 1.000000e+00 : f32
    %24 = vector.broadcast %cst_12 : f32 to vector<8x32xf32>
    %25 = arith.addf %24, %23 : vector<8x32xf32>
    %26 = arith.divf %24, %25 : vector<8x32xf32>
    %27 = vector.extract_strided_slice %14 {offsets = [0, 64], sizes = [8, 32], strides = [1, 1]} : vector<8x128xf32> to vector<8x32xf32>
    %28 = math.tanh %27 : vector<8x32xf32>
    %29 = vector.extract_strided_slice %14 {offsets = [0, 96], sizes = [8, 32], strides = [1, 1]} : vector<8x128xf32> to vector<8x32xf32>
    %30 = arith.negf %29 : vector<8x32xf32>
    %31 = math.exp %30 : vector<8x32xf32>
    %cst_13 = arith.constant 1.000000e+00 : f32
    %32 = vector.broadcast %cst_13 : f32 to vector<8x32xf32>
    %33 = arith.addf %32, %31 : vector<8x32xf32>
    %34 = arith.divf %32, %33 : vector<8x32xf32>
    %35 = arith.mulf %26, %10 : vector<8x32xf32>
    %36 = arith.mulf %20, %28 : vector<8x32xf32>
    %37 = arith.addf %35, %36 : vector<8x32xf32>
    %38 = math.tanh %37 : vector<8x32xf32>
    %39 = arith.mulf %34, %38 : vector<8x32xf32>
    %c0_14 = arith.constant 0 : index
    %c0_15 = arith.constant 0 : index
    %c0_16 = arith.constant 0 : index
    %40 = vector.load %arg7[%c0_14, %c0_15, %c0_16] : memref<8x8x32xf32, #tpu.memory_space<vmem>>, vector<1x8x32xf32>
    %41 = vector.shape_cast %40 : vector<1x8x32xf32> to vector<8x32xf32>
    %42 = vector.shape_cast %39 : vector<8x32xf32> to vector<1x8x32xf32>
    tpu.vector_store %arg7[%c0_14, %c0_15, %c0_16], %42 {strides = array<i32>} : memref<8x8x32xf32, #tpu.memory_space<vmem>>, vector<1x8x32xf32>,
    %43 = vector.extract_strided_slice %7 {offsets = [1, 0, 0], sizes = [1, 8, 128], strides = [1, 1, 1]} : vector<8x8x128xf32> to vector<1x8x128xf32>
    %44 = vector.shape_cast %43 : vector<1x8x128xf32> to vector<8x128xf32>
    %cst_17 = arith.constant dense<0.000000e+00> : vector<8x128xf32>
    %45 = tpu.matmul %39, %8, %cst_17 {dimension_numbers = #tpu.dot_dimension_numbers<[1], [0], [0], [1], [0, 0, 1, 1], [], []>} : vector<8x32xf32>, vector<32x128xf32>, vector<8x128xf32> -> vector<8x128xf32>
    %46 = arith.addf %44, %45 : vector<8x128xf32>
    %47 = vector.extract_strided_slice %46 {offsets = [0, 0], sizes = [8, 32], strides = [1, 1]} : vector<8x128xf32> to vector<8x32xf32>
    %48 = arith.negf %47 : vector<8x32xf32>
    %49 = math.exp %48 : vector<8x32xf32>
    %cst_18 = arith.constant 1.000000e+00 : f32
    %50 = vector.broadcast %cst_18 : f32 to vector<8x32xf32>
    %51 = arith.addf %50, %49 : vector<8x32xf32>
    %52 = arith.divf %50, %51 : vector<8x32xf32>
    %53 = vector.extract_strided_slice %46 {offsets = [0, 32], sizes = [8, 32], strides = [1, 1]} : vector<8x128xf32> to vector<8x32xf32>
    %54 = arith.negf %53 : vector<8x32xf32>
    %55 = math.exp %54 : vector<8x32xf32>
    %cst_19 = arith.constant 1.000000e+00 : f32
    %56 = vector.broadcast %cst_19 : f32 to vector<8x32xf32>
    %57 = arith.addf %56, %55 : vector<8x32xf32>
    %58 = arith.divf %56, %57 : vector<8x32xf32>
    %59 = vector.extract_strided_slice %46 {offsets = [0, 64], sizes = [8, 32], strides = [1, 1]} : vector<8x128xf32> to vector<8x32xf32>
    %60 = math.tanh %59 : vector<8x32xf32>
    %61 = vector.extract_strided_slice %46 {offsets = [0, 96], sizes = [8, 32], strides = [1, 1]} : vector<8x128xf32> to vector<8x32xf32>
    %62 = arith.negf %61 : vector<8x32xf32>
    %63 = math.exp %62 : vector<8x32xf32>
    %cst_20 = arith.constant 1.000000e+00 : f32
    %64 = vector.broadcast %cst_20 : f32 to vector<8x32xf32>
    %65 = arith.addf %64, %63 : vector<8x32xf32>
    %66 = arith.divf %64, %65 : vector<8x32xf32>
    %67 = arith.mulf %58, %37 : vector<8x32xf32>
    %68 = arith.mulf %52, %60 : vector<8x32xf32>
    %69 = arith.addf %67, %68 : vector<8x32xf32>
    %70 = math.tanh %69 : vector<8x32xf32>
    %71 = arith.mulf %66, %70 : vector<8x32xf32>
    %c1 = arith.constant 1 : index
    %c0_21 = arith.constant 0 : index
    %c0_22 = arith.constant 0 : index
    %72 = vector.load %arg7[%c1, %c0_21, %c0_22] : memref<8x8x32xf32, #tpu.memory_space<vmem>>, vector<1x8x32xf32>
    %73 = vector.shape_cast %72 : vector<1x8x32xf32> to vector<8x32xf32>
    %74 = vector.shape_cast %71 : vector<8x32xf32> to vector<1x8x32xf32>
    tpu.vector_store %arg7[%c1, %c0_21, %c0_22], %74 {strides = array<i32>} : memref<8x8x32xf32, #tpu.memory_space<vmem>>, vector<1x8x32xf32>,
    %75 = vector.extract_strided_slice %7 {offsets = [2, 0, 0], sizes = [1, 8, 128], strides = [1, 1, 1]} : vector<8x8x128xf32> to vector<1x8x128xf32>
    %76 = vector.shape_cast %75 : vector<1x8x128xf32> to vector<8x128xf32>
    %cst_23 = arith.constant dense<0.000000e+00> : vector<8x128xf32>
    %77 = tpu.matmul %71, %8, %cst_23 {dimension_numbers = #tpu.dot_dimension_numbers<[1], [0], [0], [1], [0, 0, 1, 1], [], []>} : vector<8x32xf32>, vector<32x128xf32>, vector<8x128xf32> -> vector<8x128xf32>
    %78 = arith.addf %76, %77 : vector<8x128xf32>
    %79 = vector.extract_strided_slice %78 {offsets = [0, 0], sizes = [8, 32], strides = [1, 1]} : vector<8x128xf32> to vector<8x32xf32>
    %80 = arith.negf %79 : vector<8x32xf32>
    %81 = math.exp %80 : vector<8x32xf32>
    %cst_24 = arith.constant 1.000000e+00 : f32
    %82 = vector.broadcast %cst_24 : f32 to vector<8x32xf32>
    %83 = arith.addf %82, %81 : vector<8x32xf32>
    %84 = arith.divf %82, %83 : vector<8x32xf32>
    %85 = vector.extract_strided_slice %78 {offsets = [0, 32], sizes = [8, 32], strides = [1, 1]} : vector<8x128xf32> to vector<8x32xf32>
    %86 = arith.negf %85 : vector<8x32xf32>
    %87 = math.exp %86 : vector<8x32xf32>
    %cst_25 = arith.constant 1.000000e+00 : f32
    %88 = vector.broadcast %cst_25 : f32 to vector<8x32xf32>
    %89 = arith.addf %88, %87 : vector<8x32xf32>
    %90 = arith.divf %88, %89 : vector<8x32xf32>
    %91 = vector.extract_strided_slice %78 {offsets = [0, 64], sizes = [8, 32], strides = [1, 1]} : vector<8x128xf32> to vector<8x32xf32>
    %92 = math.tanh %91 : vector<8x32xf32>
    %93 = vector.extract_strided_slice %78 {offsets = [0, 96], sizes = [8, 32], strides = [1, 1]} : vector<8x128xf32> to vector<8x32xf32>
    %94 = arith.negf %93 : vector<8x32xf32>
    %95 = math.exp %94 : vector<8x32xf32>
    %cst_26 = arith.constant 1.000000e+00 : f32
    %96 = vector.broadcast %cst_26 : f32 to vector<8x32xf32>
    %97 = arith.addf %96, %95 : vector<8x32xf32>
    %98 = arith.divf %96, %97 : vector<8x32xf32>
    %99 = arith.mulf %90, %69 : vector<8x32xf32>
    %100 = arith.mulf %84, %92 : vector<8x32xf32>
    %101 = arith.addf %99, %100 : vector<8x32xf32>
    %102 = math.tanh %101 : vector<8x32xf32>
    %103 = arith.mulf %98, %102 : vector<8x32xf32>
    %c2 = arith.constant 2 : index
    %c0_27 = arith.constant 0 : index
    %c0_28 = arith.constant 0 : index
    %104 = vector.load %arg7[%c2, %c0_27, %c0_28] : memref<8x8x32xf32, #tpu.memory_space<vmem>>, vector<1x8x32xf32>
    %105 = vector.shape_cast %104 : vector<1x8x32xf32> to vector<8x32xf32>
    %106 = vector.shape_cast %103 : vector<8x32xf32> to vector<1x8x32xf32>
    tpu.vector_store %arg7[%c2, %c0_27, %c0_28], %106 {strides = array<i32>} : memref<8x8x32xf32, #tpu.memory_space<vmem>>, vector<1x8x32xf32>,
    %107 = vector.extract_strided_slice %7 {offsets = [3, 0, 0], sizes = [1, 8, 128], strides = [1, 1, 1]} : vector<8x8x128xf32> to vector<1x8x128xf32>
    %108 = vector.shape_cast %107 : vector<1x8x128xf32> to vector<8x128xf32>
    %cst_29 = arith.constant dense<0.000000e+00> : vector<8x128xf32>
    %109 = tpu.matmul %103, %8, %cst_29 {dimension_numbers = #tpu.dot_dimension_numbers<[1], [0], [0], [1], [0, 0, 1, 1], [], []>} : vector<8x32xf32>, vector<32x128xf32>, vector<8x128xf32> -> vector<8x128xf32>
    %110 = arith.addf %108, %109 : vector<8x128xf32>
    %111 = vector.extract_strided_slice %110 {offsets = [0, 0], sizes = [8, 32], strides = [1, 1]} : vector<8x128xf32> to vector<8x32xf32>
    %112 = arith.negf %111 : vector<8x32xf32>
    %113 = math.exp %112 : vector<8x32xf32>
    %cst_30 = arith.constant 1.000000e+00 : f32
    %114 = vector.broadcast %cst_30 : f32 to vector<8x32xf32>
    %115 = arith.addf %114, %113 : vector<8x32xf32>
    %116 = arith.divf %114, %115 : vector<8x32xf32>
    %117 = vector.extract_strided_slice %110 {offsets = [0, 32], sizes = [8, 32], strides = [1, 1]} : vector<8x128xf32> to vector<8x32xf32>
    %118 = arith.negf %117 : vector<8x32xf32>
    %119 = math.exp %118 : vector<8x32xf32>
    %cst_31 = arith.constant 1.000000e+00 : f32
    %120 = vector.broadcast %cst_31 : f32 to vector<8x32xf32>
    %121 = arith.addf %120, %119 : vector<8x32xf32>
    %122 = arith.divf %120, %121 : vector<8x32xf32>
    %123 = vector.extract_strided_slice %110 {offsets = [0, 64], sizes = [8, 32], strides = [1, 1]} : vector<8x128xf32> to vector<8x32xf32>
    %124 = math.tanh %123 : vector<8x32xf32>
    %125 = vector.extract_strided_slice %110 {offsets = [0, 96], sizes = [8, 32], strides = [1, 1]} : vector<8x128xf32> to vector<8x32xf32>
    %126 = arith.negf %125 : vector<8x32xf32>
    %127 = math.exp %126 : vector<8x32xf32>
    %cst_32 = arith.constant 1.000000e+00 : f32
    %128 = vector.broadcast %cst_32 : f32 to vector<8x32xf32>
    %129 = arith.addf %128, %127 : vector<8x32xf32>
    %130 = arith.divf %128, %129 : vector<8x32xf32>
    %131 = arith.mulf %122, %101 : vector<8x32xf32>
    %132 = arith.mulf %116, %124 : vector<8x32xf32>
    %133 = arith.addf %131, %132 : vector<8x32xf32>
    %134 = math.tanh %133 : vector<8x32xf32>
    %135 = arith.mulf %130, %134 : vector<8x32xf32>
    %c3 = arith.constant 3 : index
    %c0_33 = arith.constant 0 : index
    %c0_34 = arith.constant 0 : index
    %136 = vector.load %arg7[%c3, %c0_33, %c0_34] : memref<8x8x32xf32, #tpu.memory_space<vmem>>, vector<1x8x32xf32>
    %137 = vector.shape_cast %136 : vector<1x8x32xf32> to vector<8x32xf32>
    %138 = vector.shape_cast %135 : vector<8x32xf32> to vector<1x8x32xf32>
    tpu.vector_store %arg7[%c3, %c0_33, %c0_34], %138 {strides = array<i32>} : memref<8x8x32xf32, #tpu.memory_space<vmem>>, vector<1x8x32xf32>,
    %139 = vector.extract_strided_slice %7 {offsets = [4, 0, 0], sizes = [1, 8, 128], strides = [1, 1, 1]} : vector<8x8x128xf32> to vector<1x8x128xf32>
    %140 = vector.shape_cast %139 : vector<1x8x128xf32> to vector<8x128xf32>
    %cst_35 = arith.constant dense<0.000000e+00> : vector<8x128xf32>
    %141 = tpu.matmul %135, %8, %cst_35 {dimension_numbers = #tpu.dot_dimension_numbers<[1], [0], [0], [1], [0, 0, 1, 1], [], []>} : vector<8x32xf32>, vector<32x128xf32>, vector<8x128xf32> -> vector<8x128xf32>
    %142 = arith.addf %140, %141 : vector<8x128xf32>
    %143 = vector.extract_strided_slice %142 {offsets = [0, 0], sizes = [8, 32], strides = [1, 1]} : vector<8x128xf32> to vector<8x32xf32>
    %144 = arith.negf %143 : vector<8x32xf32>
    %145 = math.exp %144 : vector<8x32xf32>
    %cst_36 = arith.constant 1.000000e+00 : f32
    %146 = vector.broadcast %cst_36 : f32 to vector<8x32xf32>
    %147 = arith.addf %146, %145 : vector<8x32xf32>
    %148 = arith.divf %146, %147 : vector<8x32xf32>
    %149 = vector.extract_strided_slice %142 {offsets = [0, 32], sizes = [8, 32], strides = [1, 1]} : vector<8x128xf32> to vector<8x32xf32>
    %150 = arith.negf %149 : vector<8x32xf32>
    %151 = math.exp %150 : vector<8x32xf32>
    %cst_37 = arith.constant 1.000000e+00 : f32
    %152 = vector.broadcast %cst_37 : f32 to vector<8x32xf32>
    %153 = arith.addf %152, %151 : vector<8x32xf32>
    %154 = arith.divf %152, %153 : vector<8x32xf32>
    %155 = vector.extract_strided_slice %142 {offsets = [0, 64], sizes = [8, 32], strides = [1, 1]} : vector<8x128xf32> to vector<8x32xf32>
    %156 = math.tanh %155 : vector<8x32xf32>
    %157 = vector.extract_strided_slice %142 {offsets = [0, 96], sizes = [8, 32], strides = [1, 1]} : vector<8x128xf32> to vector<8x32xf32>
    %158 = arith.negf %157 : vector<8x32xf32>
    %159 = math.exp %158 : vector<8x32xf32>
    %cst_38 = arith.constant 1.000000e+00 : f32
    %160 = vector.broadcast %cst_38 : f32 to vector<8x32xf32>
    %161 = arith.addf %160, %159 : vector<8x32xf32>
    %162 = arith.divf %160, %161 : vector<8x32xf32>
    %163 = arith.mulf %154, %133 : vector<8x32xf32>
    %164 = arith.mulf %148, %156 : vector<8x32xf32>
    %165 = arith.addf %163, %164 : vector<8x32xf32>
    %166 = math.tanh %165 : vector<8x32xf32>
    %167 = arith.mulf %162, %166 : vector<8x32xf32>
    %c4 = arith.constant 4 : index
    %c0_39 = arith.constant 0 : index
    %c0_40 = arith.constant 0 : index
    %168 = vector.load %arg7[%c4, %c0_39, %c0_40] : memref<8x8x32xf32, #tpu.memory_space<vmem>>, vector<1x8x32xf32>
    %169 = vector.shape_cast %168 : vector<1x8x32xf32> to vector<8x32xf32>
    %170 = vector.shape_cast %167 : vector<8x32xf32> to vector<1x8x32xf32>
    tpu.vector_store %arg7[%c4, %c0_39, %c0_40], %170 {strides = array<i32>} : memref<8x8x32xf32, #tpu.memory_space<vmem>>, vector<1x8x32xf32>,
    %171 = vector.extract_strided_slice %7 {offsets = [5, 0, 0], sizes = [1, 8, 128], strides = [1, 1, 1]} : vector<8x8x128xf32> to vector<1x8x128xf32>
    %172 = vector.shape_cast %171 : vector<1x8x128xf32> to vector<8x128xf32>
    %cst_41 = arith.constant dense<0.000000e+00> : vector<8x128xf32>
    %173 = tpu.matmul %167, %8, %cst_41 {dimension_numbers = #tpu.dot_dimension_numbers<[1], [0], [0], [1], [0, 0, 1, 1], [], []>} : vector<8x32xf32>, vector<32x128xf32>, vector<8x128xf32> -> vector<8x128xf32>
    %174 = arith.addf %172, %173 : vector<8x128xf32>
    %175 = vector.extract_strided_slice %174 {offsets = [0, 0], sizes = [8, 32], strides = [1, 1]} : vector<8x128xf32> to vector<8x32xf32>
    %176 = arith.negf %175 : vector<8x32xf32>
    %177 = math.exp %176 : vector<8x32xf32>
    %cst_42 = arith.constant 1.000000e+00 : f32
    %178 = vector.broadcast %cst_42 : f32 to vector<8x32xf32>
    %179 = arith.addf %178, %177 : vector<8x32xf32>
    %180 = arith.divf %178, %179 : vector<8x32xf32>
    %181 = vector.extract_strided_slice %174 {offsets = [0, 32], sizes = [8, 32], strides = [1, 1]} : vector<8x128xf32> to vector<8x32xf32>
    %182 = arith.negf %181 : vector<8x32xf32>
    %183 = math.exp %182 : vector<8x32xf32>
    %cst_43 = arith.constant 1.000000e+00 : f32
    %184 = vector.broadcast %cst_43 : f32 to vector<8x32xf32>
    %185 = arith.addf %184, %183 : vector<8x32xf32>
    %186 = arith.divf %184, %185 : vector<8x32xf32>
    %187 = vector.extract_strided_slice %174 {offsets = [0, 64], sizes = [8, 32], strides = [1, 1]} : vector<8x128xf32> to vector<8x32xf32>
    %188 = math.tanh %187 : vector<8x32xf32>
    %189 = vector.extract_strided_slice %174 {offsets = [0, 96], sizes = [8, 32], strides = [1, 1]} : vector<8x128xf32> to vector<8x32xf32>
    %190 = arith.negf %189 : vector<8x32xf32>
    %191 = math.exp %190 : vector<8x32xf32>
    %cst_44 = arith.constant 1.000000e+00 : f32
    %192 = vector.broadcast %cst_44 : f32 to vector<8x32xf32>
    %193 = arith.addf %192, %191 : vector<8x32xf32>
    %194 = arith.divf %192, %193 : vector<8x32xf32>
    %195 = arith.mulf %186, %165 : vector<8x32xf32>
    %196 = arith.mulf %180, %188 : vector<8x32xf32>
    %197 = arith.addf %195, %196 : vector<8x32xf32>
    %198 = math.tanh %197 : vector<8x32xf32>
    %199 = arith.mulf %194, %198 : vector<8x32xf32>
    %c5 = arith.constant 5 : index
    %c0_45 = arith.constant 0 : index
    %c0_46 = arith.constant 0 : index
    %200 = vector.load %arg7[%c5, %c0_45, %c0_46] : memref<8x8x32xf32, #tpu.memory_space<vmem>>, vector<1x8x32xf32>
    %201 = vector.shape_cast %200 : vector<1x8x32xf32> to vector<8x32xf32>
    %202 = vector.shape_cast %199 : vector<8x32xf32> to vector<1x8x32xf32>
    tpu.vector_store %arg7[%c5, %c0_45, %c0_46], %202 {strides = array<i32>} : memref<8x8x32xf32, #tpu.memory_space<vmem>>, vector<1x8x32xf32>,
    %203 = vector.extract_strided_slice %7 {offsets = [6, 0, 0], sizes = [1, 8, 128], strides = [1, 1, 1]} : vector<8x8x128xf32> to vector<1x8x128xf32>
    %204 = vector.shape_cast %203 : vector<1x8x128xf32> to vector<8x128xf32>
    %cst_47 = arith.constant dense<0.000000e+00> : vector<8x128xf32>
    %205 = tpu.matmul %199, %8, %cst_47 {dimension_numbers = #tpu.dot_dimension_numbers<[1], [0], [0], [1], [0, 0, 1, 1], [], []>} : vector<8x32xf32>, vector<32x128xf32>, vector<8x128xf32> -> vector<8x128xf32>
    %206 = arith.addf %204, %205 : vector<8x128xf32>
    %207 = vector.extract_strided_slice %206 {offsets = [0, 0], sizes = [8, 32], strides = [1, 1]} : vector<8x128xf32> to vector<8x32xf32>
    %208 = arith.negf %207 : vector<8x32xf32>
    %209 = math.exp %208 : vector<8x32xf32>
    %cst_48 = arith.constant 1.000000e+00 : f32
    %210 = vector.broadcast %cst_48 : f32 to vector<8x32xf32>
    %211 = arith.addf %210, %209 : vector<8x32xf32>
    %212 = arith.divf %210, %211 : vector<8x32xf32>
    %213 = vector.extract_strided_slice %206 {offsets = [0, 32], sizes = [8, 32], strides = [1, 1]} : vector<8x128xf32> to vector<8x32xf32>
    %214 = arith.negf %213 : vector<8x32xf32>
    %215 = math.exp %214 : vector<8x32xf32>
    %cst_49 = arith.constant 1.000000e+00 : f32
    %216 = vector.broadcast %cst_49 : f32 to vector<8x32xf32>
    %217 = arith.addf %216, %215 : vector<8x32xf32>
    %218 = arith.divf %216, %217 : vector<8x32xf32>
    %219 = vector.extract_strided_slice %206 {offsets = [0, 64], sizes = [8, 32], strides = [1, 1]} : vector<8x128xf32> to vector<8x32xf32>
    %220 = math.tanh %219 : vector<8x32xf32>
    %221 = vector.extract_strided_slice %206 {offsets = [0, 96], sizes = [8, 32], strides = [1, 1]} : vector<8x128xf32> to vector<8x32xf32>
    %222 = arith.negf %221 : vector<8x32xf32>
    %223 = math.exp %222 : vector<8x32xf32>
    %cst_50 = arith.constant 1.000000e+00 : f32
    %224 = vector.broadcast %cst_50 : f32 to vector<8x32xf32>
    %225 = arith.addf %224, %223 : vector<8x32xf32>
    %226 = arith.divf %224, %225 : vector<8x32xf32>
    %227 = arith.mulf %218, %197 : vector<8x32xf32>
    %228 = arith.mulf %212, %220 : vector<8x32xf32>
    %229 = arith.addf %227, %228 : vector<8x32xf32>
    %230 = math.tanh %229 : vector<8x32xf32>
    %231 = arith.mulf %226, %230 : vector<8x32xf32>
    %c6 = arith.constant 6 : index
    %c0_51 = arith.constant 0 : index
    %c0_52 = arith.constant 0 : index
    %232 = vector.load %arg7[%c6, %c0_51, %c0_52] : memref<8x8x32xf32, #tpu.memory_space<vmem>>, vector<1x8x32xf32>
    %233 = vector.shape_cast %232 : vector<1x8x32xf32> to vector<8x32xf32>
    %234 = vector.shape_cast %231 : vector<8x32xf32> to vector<1x8x32xf32>
    tpu.vector_store %arg7[%c6, %c0_51, %c0_52], %234 {strides = array<i32>} : memref<8x8x32xf32, #tpu.memory_space<vmem>>, vector<1x8x32xf32>,
    %235 = vector.extract_strided_slice %7 {offsets = [7, 0, 0], sizes = [1, 8, 128], strides = [1, 1, 1]} : vector<8x8x128xf32> to vector<1x8x128xf32>
    %236 = vector.shape_cast %235 : vector<1x8x128xf32> to vector<8x128xf32>
    %cst_53 = arith.constant dense<0.000000e+00> : vector<8x128xf32>
    %237 = tpu.matmul %231, %8, %cst_53 {dimension_numbers = #tpu.dot_dimension_numbers<[1], [0], [0], [1], [0, 0, 1, 1], [], []>} : vector<8x32xf32>, vector<32x128xf32>, vector<8x128xf32> -> vector<8x128xf32>
    %238 = arith.addf %236, %237 : vector<8x128xf32>
    %239 = vector.extract_strided_slice %238 {offsets = [0, 0], sizes = [8, 32], strides = [1, 1]} : vector<8x128xf32> to vector<8x32xf32>
    %240 = arith.negf %239 : vector<8x32xf32>
    %241 = math.exp %240 : vector<8x32xf32>
    %cst_54 = arith.constant 1.000000e+00 : f32
    %242 = vector.broadcast %cst_54 : f32 to vector<8x32xf32>
    %243 = arith.addf %242, %241 : vector<8x32xf32>
    %244 = arith.divf %242, %243 : vector<8x32xf32>
    %245 = vector.extract_strided_slice %238 {offsets = [0, 32], sizes = [8, 32], strides = [1, 1]} : vector<8x128xf32> to vector<8x32xf32>
    %246 = arith.negf %245 : vector<8x32xf32>
    %247 = math.exp %246 : vector<8x32xf32>
    %cst_55 = arith.constant 1.000000e+00 : f32
    %248 = vector.broadcast %cst_55 : f32 to vector<8x32xf32>
    %249 = arith.addf %248, %247 : vector<8x32xf32>
    %250 = arith.divf %248, %249 : vector<8x32xf32>
    %251 = vector.extract_strided_slice %238 {offsets = [0, 64], sizes = [8, 32], strides = [1, 1]} : vector<8x128xf32> to vector<8x32xf32>
    %252 = math.tanh %251 : vector<8x32xf32>
    %253 = vector.extract_strided_slice %238 {offsets = [0, 96], sizes = [8, 32], strides = [1, 1]} : vector<8x128xf32> to vector<8x32xf32>
    %254 = arith.negf %253 : vector<8x32xf32>
    %255 = math.exp %254 : vector<8x32xf32>
    %cst_56 = arith.constant 1.000000e+00 : f32
    %256 = vector.broadcast %cst_56 : f32 to vector<8x32xf32>
    %257 = arith.addf %256, %255 : vector<8x32xf32>
    %258 = arith.divf %256, %257 : vector<8x32xf32>
    %259 = arith.mulf %250, %229 : vector<8x32xf32>
    %260 = arith.mulf %244, %252 : vector<8x32xf32>
    %261 = arith.addf %259, %260 : vector<8x32xf32>
    %262 = math.tanh %261 : vector<8x32xf32>
    %263 = arith.mulf %258, %262 : vector<8x32xf32>
    %c7 = arith.constant 7 : index
    %c0_57 = arith.constant 0 : index
    %c0_58 = arith.constant 0 : index
    %264 = vector.load %arg7[%c7, %c0_57, %c0_58] : memref<8x8x32xf32, #tpu.memory_space<vmem>>, vector<1x8x32xf32>
    %265 = vector.shape_cast %264 : vector<1x8x32xf32> to vector<8x32xf32>
    %266 = vector.shape_cast %263 : vector<8x32xf32> to vector<1x8x32xf32>
    tpu.vector_store %arg7[%c7, %c0_57, %c0_58], %266 {strides = array<i32>} : memref<8x8x32xf32, #tpu.memory_space<vmem>>, vector<1x8x32xf32>,
    %c0_59 = arith.constant 0 : index
    %c0_60 = arith.constant 0 : index
    %c0_61 = arith.constant 0 : index
    %267 = vector.load %arg7[%c0_59, %c0_60, %c0_61] : memref<8x8x32xf32, #tpu.memory_space<vmem>>, vector<8x8x32xf32>
    %268 = vector.shape_cast %267 : vector<8x8x32xf32> to vector<64x32xf32>
    %c0_62 = arith.constant 0 : index
    %c0_63 = arith.constant 0 : index
    %269 = vector.load %arg4[%c0_62, %c0_63] : memref<32x64xf32, #tpu.memory_space<vmem>>, vector<32x64xf32>
    %cst_64 = arith.constant dense<0.000000e+00> : vector<64x64xf32>
    %270 = tpu.matmul %268, %269, %cst_64 {dimension_numbers = #tpu.dot_dimension_numbers<[1], [0], [0], [1], [0, 0, 1, 1], [], []>} : vector<64x32xf32>, vector<32x64xf32>, vector<64x64xf32> -> vector<64x64xf32>
    %c0_65 = arith.constant 0 : index
    %c0_66 = arith.constant 0 : index
    %271 = vector.load %arg5[%c0_65, %c0_66] : memref<1x64xf32, #tpu.memory_space<vmem>>, vector<1x64xf32>
    %272 = vector.broadcast %271 : vector<1x64xf32> to vector<64x64xf32>
    %273 = arith.addf %270, %272 : vector<64x64xf32>
    %274 = vector.shape_cast %273 : vector<64x64xf32> to vector<8x8x64xf32>
    %c0_67 = arith.constant 0 : index
    %c0_68 = arith.constant 0 : index
    %c0_69 = arith.constant 0 : index
    %275 = vector.load %arg6[%c0_67, %c0_68, %c0_69] : memref<8x8x64xf32, #tpu.memory_space<vmem>>, vector<8x8x64xf32>
    tpu.vector_store %arg6[%c0_67, %c0_68, %c0_69], %274 {strides = array<i32>} : memref<8x8x64xf32, #tpu.memory_space<vmem>>, vector<8x8x64xf32>,
    return
  }
}

</mosaic_0001>

<bundles_post_ra>
// kernel: tpu_custom_call.1
= control target key start
LH: loop header
LB: loop body
LE: loop exit
PB: predicated region body
PF: predicated region fallthrough
CT: control target
= control target key end

     0   :  { %11 = vsyncpa [#allocation4], 0  ;;  %s1282_s0 = inlined_call_operand.hbm [shape: f32[8,8,48], index: 0, kind: input, shape index: {}]   ;;  %s1283_s1 = inlined_call_operand.hbm [shape: f32[48,128], index: 1, kind: input, shape index: {}]   ;;  %s1284_s2 = inlined_call_operand.hbm [shape: f32[32,128], index: 2, kind: input, shape index: {}]   ;;  %s1285_s3 = inlined_call_operand.vmem [shape: f32[1,128], index: 3, kind: input, shape index: {}]   ;;  %s1286_s4 = inlined_call_operand.hbm [shape: f32[32,64], index: 4, kind: input, shape index: {}]   ;;  %s1287_s5 = inlined_call_operand.vmem [shape: f32[1,64], index: 5, kind: input, shape index: {}]   ;;  %s1288_s6 = inlined_call_operand.hbm [shape: f32[8,8,64], index: 6, kind: output, shape index: {}]  }
   0x1   :  { %12 = vsyncpa [#allocation7], 0 }
   0x2   :  { %13 = vsyncpa [#allocation10], 0 }
   0x3   :  { %14 = vsyncpa [#allocation5], 0  ;;  %s32_s23 = sshll.u32 %s1283_s1, 4  ;;  %s1060_s24 = smov [#allocation6]   ;;  %s33_s23 = int_to_ptr.hbm [resolvable:$true] %s32_s23 }
   0x4   :  { %s34_s25 = sshll.u32 %s1060_s24, 4  ;;  %s19_s28 = sshll.u32 %s1282_s0, 4  ;;  %s35_s25 = int_to_ptr.vmem [resolvable:$true] %s34_s25  ;;  %s20_s28 = int_to_ptr.hbm [resolvable:$true] %s19_s28 }
   0x5   :  { %s1061_s29 = smov 128   ;;  %s1062_s30 = smov 8  }
   0x6   :  { %40 = dma.hbm_to_vmem [thread:$0]  %s33_s23, 768, %s35_s25, [#allocation7], %s1061_s29, %s1061_s29, %s1062_s30  }
   0x7   :  { %s1063_s7 = smov [#allocation3]   ;;  %s45_s1 = sshll.u32 %s1284_s2, 4  ;;  %s46_s1 = int_to_ptr.hbm [resolvable:$true] %s45_s1 }
   0x8   :  { %s21_s8 = sshll.u32 %s1063_s7, 4  ;;  %s60_s12 = sshll.u32 %s1286_s4, 4  ;;  %s22_s8 = int_to_ptr.vmem [resolvable:$true] %s21_s8  ;;  %s61_s12 = int_to_ptr.hbm [resolvable:$true] %s60_s12 }
   0x9   :  { %27 = dma.hbm_to_vmem [thread:$0]  %s20_s28, 1024, %s22_s8, [#allocation4], %s1061_s29, %s1061_s29, %s1062_s30  }
   0xa   :  { %s1064_s13 = smov [#allocation8]   ;;  %s1065_s15 = smov [#allocation9]  }
   0xb   :  { %s47_s14 = sshll.u32 %s1064_s13, 4  ;;  %s62_s2 = sshll.u32 %s1065_s15, 4  ;;  %s48_s14 = int_to_ptr.vmem [resolvable:$true] %s47_s14  ;;  %s63_s2 = int_to_ptr.vmem [resolvable:$true] %s62_s2 }
   0xc   :  { %53 = dma.hbm_to_vmem [thread:$0]  %s46_s1, 512, %s48_s14, [#allocation7], %s1061_s29, %s1061_s29, %s1062_s30  }
   0xd   :  { %68 = dma.hbm_to_vmem [thread:$0]  %s61_s12, 512, %s63_s2, [#allocation10], %s1061_s29, %s1061_s29, %s1062_s30  }
   0xe   :  { %1052 = dma.done.wait [#allocation4], 1024  }
   0xf   :  { %1053 = vsyncadd [#allocation4], 4294966272 }
  0x10   :  { %1054 = dma.done.wait [#allocation7], 1280  }
  0x11   :  { %1055 = vsyncadd [#allocation7], 4294966016 }
  0x12   :  { %1056 = dma.done.wait [#allocation10], 512  }
  0x13   :  { %1057 = vsyncadd [#allocation10], 4294966784  ;;  %v100_v0 = vld [vmem:[#allocation6 + $0x28] sm:$0xff]  ;;  %v99_v1 = vld [vmem:[#allocation6 + $0x20] sm:$0xff]  ;;  %vm105_vm0 = vcmask 392192   ;;  %v1066_v11 = vmov 0.0  }
  0x14   :  { %140 = vmatpush.msra.mxu0 %v100_v0  ;;  %v1129_v2 = vld [vmem:[#allocation8 + $0x18] sm:$0xff]  ;;  %846 = vmatpush.msra.mxu2 %v100_v0  ;;  %v98_v3 = vld [vmem:[#allocation6 + $0x18] sm:$0xff]  ;;  %v1132_v4 = vld [vmem:[#allocation8 + $0x10] sm:$0xff]  ;;  %s1067_s17 = smov 64   ;;  %vm175_vm5 = vcmask 261120   ;;  %s800_s23 = sshll.u32 %s1288_s6, 4  ;;  %s801_s23 = int_to_ptr.hbm [resolvable:$true] %s800_s23 }
  0x15   :  { %191 = vmatpush.msra.mxu1 %v1129_v2  ;;  %520 = vmatpush.msra.mxu3 %v1129_v2  ;;  %v1135_v5 = vld [vmem:[#allocation8 + $0x8] sm:$0xff]  ;;  %v97_v6 = vld [vmem:[#allocation6 + $0x10] sm:$0xff]  ;;  %v96_v8 = vld [vmem:[#allocation6 + $0x8] sm:$0xff] }
  0x16   :  { %141 = vmatpush.msra.mxu0 %v99_v1  ;;  %847 = vmatpush.msra.mxu2 %v99_v1  ;;  %v1139_v7 = vld [vmem:[#allocation8] sm:$0xff]  ;;  %v95_v9 = vld [vmem:[#allocation6] sm:$0xff]  ;;  %v94_v38 = vld [vmem:[#allocation3 + $0x38] sm:$0xff] }
  0x17   :  { %192 = vmatpush.msra.mxu1 %v1132_v4  ;;  %521 = vmatpush.msra.mxu3 %v1132_v4  ;;  %v87_v10 = vld [vmem:[#allocation3] sm:$0xff]  ;;  %v93_v37 = vld [vmem:[#allocation3 + $0x30] sm:$0xff]  ;;  %v88_v41 = vld [vmem:[#allocation3 + $0x8] sm:$0xff] }
  0x18   :  { %142 = vmatpush.msra.mxu0 %v98_v3  ;;  %848 = vmatpush.msra.mxu2 %v98_v3  ;;  %v1161_v12 = vld [vmem:[%s1285_s3] ss:$0 sm:$0xff]  ;;  %s1068_s3 = smov 32  }
  0x19   :  { %193 = vmatpush.msra.mxu1 %v1135_v5  ;;  %522 = vmatpush.msra.mxu3 %v1135_v5 }
  0x1a   :  { %143 = vmatpush.msra.mxu0 %v97_v6  ;;  %849 = vmatpush.msra.mxu2 %v97_v6 }
  0x1b   :  { %194 = vmatpush.msra.mxu1 %v1139_v7  ;;  %523 = vmatpush.msra.mxu3 %v1139_v7 }
  0x1c   :  { %144 = vmatpush.msra.mxu0 %v96_v8  ;;  %195 = vmatmul.f32.vlgmr.msra.gmra.mxu1 %v1066_v11  ;;  %v89_v11 = vld [vmem:[#allocation3 + $0x10] sm:$0xff] }
  0x1d   :  { %850 = vmatpush.msra.mxu2 %v96_v8  ;;  %388 = vmatpush.msrb.mxu1 %v1129_v2 }
  0x1e   :  { %145 = vmatpush.msra.mxu0 %v95_v9 }
  0x1f   :  { %815 = vmatmul.msk.f32.vlgmr.msra.gmra.mxu0 %vm105_vm0, %v87_v10  ;;  %851 = vmatpush.msra.mxu2 %v95_v9 }
  0x20   :  { %389 = vmatpush.msrb.mxu1 %v1132_v4  ;;  %821 = vmatmul.msk.f32.vlgmr.msra.gmra.mxu2 %vm105_vm0, %v93_v37 }
  0x21   :  { %256 = vmatpush.msrb.mxu2 %v1129_v2 }
  0x22   :  { %390 = vmatpush.msrb.mxu1 %v1135_v5 }
  0x23   :  { %257 = vmatpush.msrb.mxu2 %v1132_v4 }
  0x24   :  { %391 = vmatpush.msrb.mxu1 %v1139_v7 }
  0x25   :  { %258 = vmatpush.msrb.mxu2 %v1135_v5 }
  0x26   :  { %586 = vmatpush.msra.mxu1 %v1129_v2 }
  0x27   :  { %259 = vmatpush.msrb.mxu2 %v1139_v7  ;;  %816 = vmatmul.msk.f32.gmra.mxu0 %vm105_vm0, %v88_v41 }
  0x28   :  { %587 = vmatpush.msra.mxu1 %v1132_v4  ;;  %822 = vmatmul.msk.f32.gmra.mxu2 %vm105_vm0, %v94_v38 }
  0x29   :  { %322 = vmatpush.msra.mxu2 %v1129_v2 }
  0x2a   :  { %588 = vmatpush.msra.mxu1 %v1135_v5 }
  0x2b   :  { %323 = vmatpush.msra.mxu2 %v1132_v4 }
  0x2c   :  { %589 = vmatpush.msra.mxu1 %v1139_v7 }
  0x2d   :  { %324 = vmatpush.msra.mxu2 %v1135_v5 }
  0x2f   :  { %325 = vmatpush.msra.mxu2 %v1139_v7  ;;  %817 = vmatmul.msk.f32.gmra.mxu0 %vm105_vm0, %v89_v11 }
  0x99   :  { %v196_v14 = vpop.f32.mrf.mxu1 }
  0x9c   :  { %v147_v13 = vpop.f32.mrf.mxu0 }
  0x9d   :  { %v148_v15 = vadd.f32 %v1161_v12, %v147_v13 }
  0x9f   :  { %v199_v16 = vadd.f32 %v196_v14, %v148_v15 }
  0xa1   :  { %868 = vtanh.f32 %v199_v16  ;;  %v823_v18 = vmul.f32 -1.442695, %v199_v16 }
  0xa3   :  { %870 = vpow2.f32 %v823_v18  ;;  %v1181_v43 = vpop.f32.mrf.mxu2 }
  0xa4   :  { %v150_v45 = vpop.f32.mrf.mxu0 }
  0xa5   :  { %v151_v46 = vadd.f32 %v1161_v12, %v150_v45 }
  0xa7   :  { %v869_v17 = vpop.eup %868 }
  0xa8   :  { %222 = vrot.lane.b32.xlu0 %v869_v17, %s1067_s17 }
  0xa9   :  { %v871_v19 = vpop.eup %870 }
  0xaa   :  { %v203_v20 = vadd.f32 1.0, %v871_v19 }
  0xab   :  { %v1183_v44 = vpop.f32.mrf.mxu2 }
  0xac   :  { %872 = vrcp.f32 %v203_v20  ;;  %v215_v26 = vand.u32 2147483648, %v203_v20  ;;  %vm209_vm2 = vweird.f32 %v203_v20  ;;  %v213_v27 = vand.u32 2147483647, %v203_v20  ;;  %v153_v14 = vpop.f32.mrf.mxu0 }
  0xad   :  { %v154_v15 = vadd.f32 %v1161_v12, %v153_v14 }
  0xae   :  { %v216_v29 = vor.u32 1.1754944e-38, %v215_v26  ;;  %vm214_vm4 = vcmp.eq.f32.partialorder %v213_v27, 8.507059e+37 }
  0xb2   :  { %v873_v21 = vpop.eup %872 }
  0xb3   :  { %v205_v22 = vmul.f32 %v873_v21, %v203_v20  ;;  %vm210_vm1 = vweird.f32 %v873_v21 }
  0xb4   :  { %vm211_vm3 = vmor %vm209_vm2, %vm210_vm1 }
  0xb5   :  { %v206_v23 = vsub.f32 1.0, %v205_v22 }
  0xb7   :  { %v207_v24 = vmul.f32 %v873_v21, %v206_v23 }
  0xb9   :  { %v208_v25 = vadd.f32 %v873_v21, %v207_v24 }
  0xbb   :  { %v212_v28 = vsel %vm211_vm3, %v873_v21, %v208_v25 }
  0xbc   :  { %v217_v31 = vsel %vm214_vm4, %v216_v29, %v212_v28 }
  0xbd   :  { %v220_v33 = vmul.f32 0.0, %v217_v31 }
 0x11a   :  { %v223_v30 = vpop.permute.xlu0 %222 }
 0x11b   :  { %v225_v32 = vmul.f32 %v223_v30, %v217_v31 }
 0x11d   :  { %227 = vrot.lane.b32.xlu0 %v225_v32, %s1068_s3 }
 0x18f   :  { %v228_v34 = vpop.permute.xlu0 %227 }
 0x190   :  { %v230_v35 = vadd.f32 %v228_v34, %v220_v33  ;;  %v90_v34 = vld [vmem:[#allocation3 + $0x18] sm:$0xff] }
 0x191   :  { %818 = vmatmul.msk.f32.gmra.mxu0 %vm105_vm0, %v90_v34  ;;  %v713_v34 = vld [vmem:[#allocation9 + $0x8] sm:$0xff] }
 0x192   :  { %874 = vtanh.f32 %v230_v35 }
 0x198   :  { %v875_v36 = vpop.eup %874 }
 0x199   :  { %233 = vrot.lane.b32.xlu1 %v875_v36, %s1067_s17 }
 0x20b   :  { %v234_v39 = vpop.permute.xlu1 %233 }
 0x20c   :  { %v236_v40 = vmul.f32 %v234_v39, %v217_v31 }
 0x20e   :  { %238 = vrot.lane.b32.xlu1 %v236_v40, %s1068_s3  ;;  %v156_v38 = vpop.f32.mrf.mxu0 }
 0x20f   :  { %v157_v39 = vadd.f32 %v1161_v12, %v156_v38 }
 0x280   :  { %v239_v42 = vpop.permute.xlu1 %238 }
 0x281   :  { %241 = vst.msk [vmem:[#allocation2] sm:$0xff] %vm175_vm5, %v239_v42  ;;  %824 = vmatmul.msk.f32.vlgmr.msrb.gmra.mxu2 %vm175_vm5, %v239_v42 }
 0x282   :  { %454 = vmatpush.msrb.mxu2 %v1129_v2 }
 0x284   :  { %455 = vmatpush.msrb.mxu2 %v1132_v4 }
 0x286   :  { %456 = vmatpush.msrb.mxu2 %v1135_v5 }
 0x288   :  { %457 = vmatpush.msrb.mxu2 %v1139_v7 }
 0x304   :  { %v261_v47 = vpop.f32.mrf.mxu2 }
 0x305   :  { %v264_v48 = vadd.f32 %v261_v47, %v151_v46 }
 0x307   :  { %876 = vtanh.f32 %v264_v48  ;;  %v825_v50 = vmul.f32 -1.442695, %v264_v48 }
 0x309   :  { %878 = vpow2.f32 %v825_v50 }
 0x30d   :  { %v877_v49 = vpop.eup %876 }
 0x30e   :  { %287 = vrot.lane.b32.xlu2 %v877_v49, %s1067_s17 }
 0x30f   :  { %v879_v51 = vpop.eup %878 }
 0x310   :  { %v268_v52 = vadd.f32 1.0, %v879_v51 }
 0x312   :  { %880 = vrcp.f32 %v268_v52  ;;  %v280_v58 = vand.u32 2147483648, %v268_v52  ;;  %vm274_vm7 = vweird.f32 %v268_v52  ;;  %v278_v59 = vand.u32 2147483647, %v268_v52 }
 0x314   :  { %v281_v61 = vor.u32 1.1754944e-38, %v280_v58  ;;  %vm279_vm9 = vcmp.eq.f32.partialorder %v278_v59, 8.507059e+37 }
 0x318   :  { %v881_v53 = vpop.eup %880 }
 0x319   :  { %v270_v54 = vmul.f32 %v881_v53, %v268_v52  ;;  %vm275_vm6 = vweird.f32 %v881_v53 }
 0x31a   :  { %vm276_vm8 = vmor %vm274_vm7, %vm275_vm6 }
 0x31b   :  { %v271_v55 = vsub.f32 1.0, %v270_v54 }
 0x31d   :  { %v272_v56 = vmul.f32 %v881_v53, %v271_v55 }
 0x31f   :  { %v273_v57 = vadd.f32 %v881_v53, %v272_v56 }
 0x321   :  { %v277_v60 = vsel %vm276_vm8, %v881_v53, %v273_v57 }
 0x322   :  { %v282_v63 = vsel %vm279_vm9, %v281_v61, %v277_v60 }
 0x323   :  { %v285_v1 = vmul.f32 %v282_v63, %v230_v35 }
 0x368   :  { %v288_v62 = vpop.permute.xlu2 %287 }
 0x369   :  { %v290_v0 = vmul.f32 %v288_v62, %v282_v63 }
 0x36b   :  { %292 = vrot.lane.b32.xlu2 %v290_v0, %s1068_s3 }
 0x3c5   :  { %v293_v3 = vpop.permute.xlu2 %292 }
 0x3c6   :  { %v295_v6 = vadd.f32 %v293_v3, %v285_v1  ;;  %v91_v3 = vld [vmem:[#allocation3 + $0x20] sm:$0xff] }
 0x3c7   :  { %819 = vmatmul.msk.f32.gmra.mxu0 %vm105_vm0, %v91_v3 }
 0x3c8   :  { %882 = vtanh.f32 %v295_v6 }
 0x3ce   :  { %v883_v8 = vpop.eup %882 }
 0x3cf   :  { %298 = vrot.lane.b32.xlu0 %v883_v8, %s1067_s17 }
 0x441   :  { %v299_v9 = vpop.permute.xlu0 %298 }
 0x442   :  { %v301_v10 = vmul.f32 %v299_v9, %v282_v63 }
 0x444   :  { %303 = vrot.lane.b32.xlu1 %v301_v10, %s1068_s3  ;;  %v159_v8 = vpop.f32.mrf.mxu0 }
 0x445   :  { %v160_v9 = vadd.f32 %v1161_v12, %v159_v8 }
 0x4b6   :  { %v304_v13 = vpop.permute.xlu1 %303 }
 0x4b7   :  { %307 = vst.msk [vmem:[#allocation2 + $0x8] sm:$0xff] %vm175_vm5, %v304_v13  ;;  %826 = vmatmul.msk.f32.vlgmr.msra.gmra.mxu2 %vm175_vm5, %v304_v13 }
 0x4b8   :  { %652 = vmatpush.msra.mxu2 %v1129_v2 }
 0x4ba   :  { %653 = vmatpush.msra.mxu2 %v1132_v4 }
 0x4bc   :  { %654 = vmatpush.msra.mxu2 %v1135_v5 }
 0x4be   :  { %655 = vmatpush.msra.mxu2 %v1139_v7 }
 0x53a   :  { %v327_v16 = vpop.f32.mrf.mxu2 }
 0x53b   :  { %v330_v17 = vadd.f32 %v327_v16, %v154_v15 }
 0x53d   :  { %884 = vtanh.f32 %v330_v17  ;;  %v827_v19 = vmul.f32 -1.442695, %v330_v17 }
 0x53f   :  { %886 = vpow2.f32 %v827_v19 }
 0x543   :  { %v885_v18 = vpop.eup %884 }
 0x544   :  { %353 = vrot.lane.b32.xlu2 %v885_v18, %s1067_s17 }
 0x545   :  { %v887_v20 = vpop.eup %886 }
 0x546   :  { %v334_v21 = vadd.f32 1.0, %v887_v20 }
 0x548   :  { %888 = vrcp.f32 %v334_v21  ;;  %v346_v7 = vand.u32 2147483648, %v334_v21  ;;  %vm340_vm11 = vweird.f32 %v334_v21  ;;  %v344_v24 = vand.u32 2147483647, %v334_v21 }
 0x54a   :  { %v347_v26 = vor.u32 1.1754944e-38, %v346_v7  ;;  %vm345_vm13 = vcmp.eq.f32.partialorder %v344_v24, 8.507059e+37 }
 0x54e   :  { %v889_v2 = vpop.eup %888 }
 0x54f   :  { %v336_v4 = vmul.f32 %v889_v2, %v334_v21  ;;  %vm341_vm10 = vweird.f32 %v889_v2 }
 0x550   :  { %vm342_vm12 = vmor %vm340_vm11, %vm341_vm10 }
 0x551   :  { %v337_v22 = vsub.f32 1.0, %v336_v4 }
 0x553   :  { %v338_v5 = vmul.f32 %v889_v2, %v337_v22 }
 0x555   :  { %v339_v23 = vadd.f32 %v889_v2, %v338_v5 }
 0x557   :  { %v343_v25 = vsel %vm342_vm12, %v889_v2, %v339_v23 }
 0x558   :  { %v348_v28 = vsel %vm345_vm13, %v347_v26, %v343_v25 }
 0x559   :  { %v351_v30 = vmul.f32 %v348_v28, %v295_v6 }
 0x59e   :  { %v354_v27 = vpop.permute.xlu2 %353 }
 0x59f   :  { %v356_v29 = vmul.f32 %v354_v27, %v348_v28 }
 0x5a1   :  { %358 = vrot.lane.b32.xlu0 %v356_v29, %s1068_s3 }
 0x613   :  { %v359_v31 = vpop.permute.xlu0 %358 }
 0x614   :  { %v361_v32 = vadd.f32 %v359_v31, %v351_v30  ;;  %v715_v31 = vld [vmem:[#allocation9 + $0x18] sm:$0xff] }
 0x615   :  { %852 = vmatpush.msrb.mxu3 %v715_v31 }
 0x616   :  { %890 = vtanh.f32 %v361_v32 }
 0x61c   :  { %v891_v33 = vpop.eup %890 }
 0x61d   :  { %364 = vrot.lane.b32.xlu1 %v891_v33, %s1067_s17  ;;  %v92_v33 = vld [vmem:[#allocation3 + $0x28] sm:$0xff] }
 0x61e   :  { %820 = vmatmul.msk.f32.gmra.mxu0 %vm105_vm0, %v92_v33  ;;  %vm785_vm0 = vcmask 523264  }
 0x68f   :  { %v365_v35 = vpop.permute.xlu1 %364 }
 0x690   :  { %v367_v36 = vmul.f32 %v365_v35, %v348_v28  ;;  %v712_v35 = vld [vmem:[#allocation9] sm:$0xff] }
 0x692   :  { %369 = vrot.lane.b32.xlu2 %v367_v36, %s1068_s3 }
 0x6ec   :  { %v370_v37 = vpop.permute.xlu2 %369 }
 0x6ed   :  { %373 = vst.msk [vmem:[#allocation2 + $0x10] sm:$0xff] %vm175_vm5, %v370_v37  ;;  %828 = vmatmul.msk.f32.vlgmr.msrb.gmra.mxu1 %vm175_vm5, %v370_v37 }
 0x6ee   :  { %756 = vmatpush.msrb.mxu1 %v715_v31 }
 0x76a   :  { %v393_v40 = vpop.f32.mrf.mxu1 }
 0x76b   :  { %v396_v41 = vadd.f32 %v393_v40, %v157_v39  ;;  %v162_v39 = vpop.f32.mrf.mxu0 }
 0x76c   :  { %v163_v40 = vadd.f32 %v1161_v12, %v162_v39 }
 0x76d   :  { %892 = vtanh.f32 %v396_v41  ;;  %v829_v45 = vmul.f32 -1.442695, %v396_v41 }
 0x76f   :  { %894 = vpow2.f32 %v829_v45  ;;  %v1230_v45 = vld [vmem:[%s1287_s5] ss:$0 sm:$0xff]  ;;  %s1069_s5 = smov [#allocation11]  }
 0x770   :  { %s798_s20 = sshll.u32 %s1069_s5, 4  ;;  %s799_s20 = int_to_ptr.vmem [resolvable:$true] %s798_s20 }
 0x773   :  { %v893_v42 = vpop.eup %892 }
 0x774   :  { %419 = vrot.lane.b32.xlu0 %v893_v42, %s1067_s17 }
 0x775   :  { %v895_v46 = vpop.eup %894 }
 0x776   :  { %v400_v47 = vadd.f32 1.0, %v895_v46 }
 0x778   :  { %896 = vrcp.f32 %v400_v47  ;;  %v412_v53 = vand.u32 2147483648, %v400_v47  ;;  %vm406_vm15 = vweird.f32 %v400_v47  ;;  %v410_v54 = vand.u32 2147483647, %v400_v47 }
 0x77a   :  { %v413_v56 = vor.u32 1.1754944e-38, %v412_v53  ;;  %vm411_vm2 = vcmp.eq.f32.partialorder %v410_v54, 8.507059e+37 }
 0x77e   :  { %v897_v48 = vpop.eup %896 }
 0x77f   :  { %v402_v49 = vmul.f32 %v897_v48, %v400_v47  ;;  %vm407_vm14 = vweird.f32 %v897_v48 }
 0x780   :  { %vm408_vm1 = vmor %vm406_vm15, %vm407_vm14 }
 0x781   :  { %v403_v50 = vsub.f32 1.0, %v402_v49 }
 0x783   :  { %v404_v51 = vmul.f32 %v897_v48, %v403_v50 }
 0x785   :  { %v405_v52 = vadd.f32 %v897_v48, %v404_v51 }
 0x787   :  { %v409_v55 = vsel %vm408_vm1, %v897_v48, %v405_v52 }
 0x788   :  { %v414_v58 = vsel %vm411_vm2, %v413_v56, %v409_v55 }
 0x789   :  { %v417_v60 = vmul.f32 %v414_v58, %v361_v32  ;;  %v714_v32 = vld [vmem:[#allocation9 + $0x10] sm:$0xff] }
 0x78a   :  { %853 = vmatpush.msrb.mxu3 %v714_v32  ;;  %757 = vmatpush.msrb.mxu1 %v714_v32 }
 0x78c   :  { %854 = vmatpush.msrb.mxu3 %v713_v34  ;;  %758 = vmatpush.msrb.mxu1 %v713_v34 }
 0x78e   :  { %855 = vmatpush.msrb.mxu3 %v712_v35  ;;  %759 = vmatpush.msrb.mxu1 %v712_v35 }
 0x7e6   :  { %v420_v57 = vpop.permute.xlu0 %419 }
 0x7e7   :  { %v422_v59 = vmul.f32 %v420_v57, %v414_v58 }
 0x7e9   :  { %424 = vrot.lane.b32.xlu1 %v422_v59, %s1068_s3 }
 0x85b   :  { %v425_v61 = vpop.permute.xlu1 %424 }
 0x85c   :  { %v427_v62 = vadd.f32 %v425_v61, %v417_v60 }
 0x85e   :  { %898 = vtanh.f32 %v427_v62 }
 0x864   :  { %v899_v63 = vpop.eup %898 }
 0x865   :  { %430 = vrot.lane.b32.xlu2 %v899_v63, %s1067_s17 }
 0x8bf   :  { %v431_v0 = vpop.permute.xlu2 %430 }
 0x8c0   :  { %v433_v1 = vmul.f32 %v431_v0, %v414_v58 }
 0x8c2   :  { %435 = vrot.lane.b32.xlu0 %v433_v1, %s1068_s3 }
 0x934   :  { %v436_v6 = vpop.permute.xlu0 %435 }
 0x935   :  { %439 = vst.msk [vmem:[#allocation2 + $0x18] sm:$0xff] %vm175_vm5, %v436_v6  ;;  %830 = vmatmul.msk.f32.vlgmr.msrb.gmra.mxu2 %vm175_vm5, %v436_v6 }
 0x93c   :  { %v707_v37 = vld [vmem:[#allocation2 + $0x18] sm:$0xff] }
 0x9b8   :  { %v459_v10 = vpop.f32.mrf.mxu2 }
 0x9b9   :  { %v462_v11 = vadd.f32 %v459_v10, %v160_v9 }
 0x9bb   :  { %900 = vtanh.f32 %v462_v11  ;;  %v831_v14 = vmul.f32 -1.442695, %v462_v11 }
 0x9bd   :  { %902 = vpow2.f32 %v831_v14  ;;  %v704_v14 = vld [vmem:[#allocation2] sm:$0xff] }
 0x9c1   :  { %v901_v13 = vpop.eup %900 }
 0x9c2   :  { %485 = vrot.lane.b32.xlu1 %v901_v13, %s1067_s17 }
 0x9c3   :  { %v903_v15 = vpop.eup %902 }
 0x9c4   :  { %v466_v16 = vadd.f32 1.0, %v903_v15 }
 0x9c6   :  { %904 = vrcp.f32 %v466_v16  ;;  %v478_v2 = vand.u32 2147483648, %v466_v16  ;;  %vm472_vm4 = vweird.f32 %v466_v16  ;;  %v476_v4 = vand.u32 2147483647, %v466_v16 }
 0x9c8   :  { %v479_v5 = vor.u32 1.1754944e-38, %v478_v2  ;;  %vm477_vm7 = vcmp.eq.f32.partialorder %v476_v4, 8.507059e+37 }
 0x9cc   :  { %v905_v17 = vpop.eup %904 }
 0x9cd   :  { %v468_v18 = vmul.f32 %v905_v17, %v466_v16  ;;  %vm473_vm3 = vweird.f32 %v905_v17  ;;  %v705_v16 = vld [vmem:[#allocation2 + $0x8] sm:$0xff] }
 0x9ce   :  { %vm474_vm6 = vmor %vm472_vm4, %vm473_vm3 }
 0x9cf   :  { %v469_v19 = vsub.f32 1.0, %v468_v18  ;;  %v166_v18 = vadd.f32 %v1161_v12, %v1181_v43 }
 0x9d1   :  { %v470_v20 = vmul.f32 %v905_v17, %v469_v19 }
 0x9d3   :  { %v471_v21 = vadd.f32 %v905_v17, %v470_v20 }
 0x9d5   :  { %v475_v22 = vsel %vm474_vm6, %v905_v17, %v471_v21  ;;  %v706_v17 = vld [vmem:[#allocation2 + $0x10] sm:$0xff] }
 0x9d6   :  { %v480_v7 = vsel %vm477_vm7, %v479_v5, %v475_v22 }
 0x9d7   :  { %v483_v25 = vmul.f32 %v480_v7, %v427_v62 }
 0xa34   :  { %v486_v23 = vpop.permute.xlu1 %485 }
 0xa35   :  { %v488_v24 = vmul.f32 %v486_v23, %v480_v7 }
 0xa37   :  { %490 = vrot.lane.b32.xlu2 %v488_v24, %s1068_s3 }
 0xa91   :  { %v491_v26 = vpop.permute.xlu2 %490 }
 0xa92   :  { %v1216_v27 = vadd.f32 %v491_v26, %v483_v25 }
 0xa94   :  { %906 = vtanh.f32 %v1216_v27 }
 0xa9a   :  { %v907_v28 = vpop.eup %906 }
 0xa9b   :  { %496 = vrot.lane.b32.xlu0 %v907_v28, %s1067_s17 }
 0xb0d   :  { %v497_v29 = vpop.permute.xlu0 %496 }
 0xb0e   :  { %v499_v30 = vmul.f32 %v497_v29, %v480_v7 }
 0xb10   :  { %501 = vrot.lane.b32.xlu1 %v499_v30, %s1068_s3 }
 0xb82   :  { %v502_v36 = vpop.permute.xlu1 %501 }
 0xb83   :  { %505 = vst.msk [vmem:[#allocation2 + $0x20] sm:$0xff] %vm175_vm5, %v502_v36  ;;  %832 = vmatmul.msk.f32.vlgmr.msra.gmra.mxu3 %vm175_vm5, %v502_v36 }
 0xb8a   :  { %v708_v38 = vld [vmem:[#allocation2 + $0x20] sm:$0xff] }
 0xb8b   :  { %841 = vmatmul.msk.f32.vlgmr.msrb.gmra.mxu3 %vm175_vm5, %v707_v37 }
 0xb93   :  { %842 = vmatmul.msk.f32.gmra.mxu3 %vm175_vm5, %v708_v38 }
 0xc06   :  { %v525_v41 = vpop.f32.mrf.mxu3 }
 0xc07   :  { %v528_v42 = vadd.f32 %v525_v41, %v163_v40 }
 0xc09   :  { %908 = vtanh.f32 %v528_v42  ;;  %v833_v51 = vmul.f32 -1.442695, %v528_v42 }
 0xc0b   :  { %910 = vpow2.f32 %v833_v51  ;;  %v169_v51 = vadd.f32 %v1161_v12, %v1183_v44 }
 0xc0e   :  { %v770_v46 = vpop.f32.mrf.mxu3 }
 0xc0f   :  { %v909_v47 = vpop.eup %908  ;;  %v771_v48 = vadd.f32 %v1230_v45, %v770_v46 }
 0xc10   :  { %551 = vrot.lane.b32.xlu2 %v909_v47, %s1067_s17 }
 0xc11   :  { %789 = vst.msk [vmem:[#allocation11 + $0x18] sm:$0xff] %vm785_vm0, %v771_v48  ;;  %v911_v52 = vpop.eup %910 }
 0xc12   :  { %v532_v53 = vadd.f32 1.0, %v911_v52 }
 0xc14   :  { %912 = vrcp.f32 %v532_v53  ;;  %v544_v59 = vand.u32 2147483648, %v532_v53  ;;  %vm538_vm9 = vweird.f32 %v532_v53  ;;  %v542_v60 = vand.u32 2147483647, %v532_v53 }
 0xc16   :  { %v773_v49 = vpop.f32.mrf.mxu3  ;;  %v545_v62 = vor.u32 1.1754944e-38, %v544_v59  ;;  %vm543_vm11 = vcmp.eq.f32.partialorder %v542_v60, 8.507059e+37 }
 0xc17   :  { %v774_v50 = vadd.f32 %v1230_v45, %v773_v49 }
 0xc19   :  { %790 = vst.msk [vmem:[#allocation11 + $0x20] sm:$0xff] %vm785_vm0, %v774_v50 }
 0xc1a   :  { %v913_v54 = vpop.eup %912 }
 0xc1b   :  { %v534_v55 = vmul.f32 %v913_v54, %v532_v53  ;;  %vm539_vm8 = vweird.f32 %v913_v54 }
 0xc1c   :  { %vm540_vm10 = vmor %vm538_vm9, %vm539_vm8 }
 0xc1d   :  { %v535_v56 = vsub.f32 1.0, %v534_v55 }
 0xc1f   :  { %v536_v57 = vmul.f32 %v913_v54, %v535_v56 }
 0xc21   :  { %v537_v58 = vadd.f32 %v913_v54, %v536_v57 }
 0xc23   :  { %v541_v61 = vsel %vm540_vm10, %v913_v54, %v537_v58 }
 0xc24   :  { %v546_v0 = vsel %vm543_vm11, %v545_v62, %v541_v61 }
 0xc25   :  { %v549_v3 = vmul.f32 %v546_v0, %v1216_v27 }
 0xc6a   :  { %v552_v63 = vpop.permute.xlu2 %551 }
 0xc6b   :  { %v554_v1 = vmul.f32 %v552_v63, %v546_v0 }
 0xc6d   :  { %556 = vrot.lane.b32.xlu0 %v554_v1, %s1068_s3 }
 0xcdf   :  { %v557_v6 = vpop.permute.xlu0 %556 }
 0xce0   :  { %v559_v8 = vadd.f32 %v557_v6, %v549_v3 }
 0xce2   :  { %914 = vtanh.f32 %v559_v8 }
 0xce8   :  { %v915_v9 = vpop.eup %914 }
 0xce9   :  { %562 = vrot.lane.b32.xlu1 %v915_v9, %s1067_s17 }
 0xd5b   :  { %v563_v10 = vpop.permute.xlu1 %562 }
 0xd5c   :  { %v565_v11 = vmul.f32 %v563_v10, %v546_v0 }
 0xd5e   :  { %567 = vrot.lane.b32.xlu2 %v565_v11, %s1068_s3 }
 0xdb8   :  { %v568_v13 = vpop.permute.xlu2 %567 }
 0xdb9   :  { %571 = vst.msk [vmem:[#allocation2 + $0x28] sm:$0xff] %vm175_vm5, %v568_v13  ;;  %834 = vmatmul.msk.f32.vlgmr.msra.gmra.mxu1 %vm175_vm5, %v568_v13 }
 0xdc0   :  { %v709_v15 = vld [vmem:[#allocation2 + $0x28] sm:$0xff] }
 0xdc1   :  { %838 = vmatmul.msk.f32.vlgmr.msrb.gmra.mxu1 %vm175_vm5, %v704_v14  ;;  %843 = vmatmul.msk.f32.gmra.mxu3 %vm175_vm5, %v709_v15 }
 0xdc9   :  { %839 = vmatmul.msk.f32.gmra.mxu1 %vm175_vm5, %v705_v16 }
 0xdd1   :  { %840 = vmatmul.msk.f32.gmra.mxu1 %vm175_vm5, %v706_v17 }
 0xe36   :  { %v591_v19 = vpop.f32.mrf.mxu1 }
 0xe37   :  { %v594_v20 = vadd.f32 %v591_v19, %v166_v18 }
 0xe39   :  { %916 = vtanh.f32 %v594_v20  ;;  %v835_v25 = vmul.f32 -1.442695, %v594_v20 }
 0xe3b   :  { %918 = vpow2.f32 %v835_v25 }
 0xe3e   :  { %v761_v21 = vpop.f32.mrf.mxu1 }
 0xe3f   :  { %v917_v2 = vpop.eup %916  ;;  %v762_v4 = vadd.f32 %v1230_v45, %v761_v21 }
 0xe40   :  { %617 = vrot.lane.b32.xlu0 %v917_v2, %s1067_s17 }
 0xe41   :  { %786 = vst.msk [vmem:[#allocation11] sm:$0xff] %vm785_vm0, %v762_v4  ;;  %v919_v26 = vpop.eup %918 }
 0xe42   :  { %v598_v27 = vadd.f32 1.0, %v919_v26 }
 0xe44   :  { %v776_v22 = vpop.f32.mrf.mxu3  ;;  %920 = vrcp.f32 %v598_v27  ;;  %v610_v33 = vand.u32 2147483648, %v598_v27  ;;  %vm604_vm13 = vweird.f32 %v598_v27  ;;  %v608_v34 = vand.u32 2147483647, %v598_v27 }
 0xe45   :  { %v777_v5 = vadd.f32 %v1230_v45, %v776_v22 }
 0xe46   :  { %v764_v23 = vpop.f32.mrf.mxu1  ;;  %v611_v36 = vor.u32 1.1754944e-38, %v610_v33  ;;  %vm609_vm15 = vcmp.eq.f32.partialorder %v608_v34, 8.507059e+37 }
 0xe47   :  { %791 = vst.msk [vmem:[#allocation11 + $0x28] sm:$0xff] %vm785_vm0, %v777_v5  ;;  %v765_v7 = vadd.f32 %v1230_v45, %v764_v23 }
 0xe49   :  { %787 = vst.msk [vmem:[#allocation11 + $0x8] sm:$0xff] %vm785_vm0, %v765_v7 }
 0xe4a   :  { %v921_v28 = vpop.eup %920 }
 0xe4b   :  { %v600_v29 = vmul.f32 %v921_v28, %v598_v27  ;;  %vm605_vm12 = vweird.f32 %v921_v28 }
 0xe4c   :  { %vm606_vm14 = vmor %vm604_vm13, %vm605_vm12 }
 0xe4d   :  { %v601_v30 = vsub.f32 1.0, %v600_v29 }
 0xe4e   :  { %v767_v43 = vpop.f32.mrf.mxu1 }
 0xe4f   :  { %v768_v24 = vadd.f32 %v1230_v45, %v767_v43  ;;  %v602_v31 = vmul.f32 %v921_v28, %v601_v30 }
 0xe51   :  { %788 = vst.msk [vmem:[#allocation11 + $0x10] sm:$0xff] %vm785_vm0, %v768_v24  ;;  %v603_v32 = vadd.f32 %v921_v28, %v602_v31 }
 0xe53   :  { %v607_v35 = vsel %vm606_vm14, %v921_v28, %v603_v32 }
 0xe54   :  { %v612_v38 = vsel %vm609_vm15, %v611_v36, %v607_v35 }
 0xe55   :  { %v615_v40 = vmul.f32 %v612_v38, %v559_v8 }
 0xeb2   :  { %v618_v37 = vpop.permute.xlu0 %617 }
 0xeb3   :  { %v620_v39 = vmul.f32 %v618_v37, %v612_v38 }
 0xeb5   :  { %622 = vrot.lane.b32.xlu1 %v620_v39, %s1068_s3 }
 0xf27   :  { %v623_v41 = vpop.permute.xlu1 %622 }
 0xf28   :  { %v625_v42 = vadd.f32 %v623_v41, %v615_v40 }
 0xf2a   :  { %922 = vtanh.f32 %v625_v42 }
 0xf30   :  { %v923_v46 = vpop.eup %922 }
 0xf31   :  { %628 = vrot.lane.b32.xlu2 %v923_v46, %s1067_s17 }
 0xf8b   :  { %v629_v47 = vpop.permute.xlu2 %628 }
 0xf8c   :  { %v631_v48 = vmul.f32 %v629_v47, %v612_v38 }
 0xf8e   :  { %633 = vrot.lane.b32.xlu0 %v631_v48, %s1068_s3 }
0x1000   :  { %v634_v49 = vpop.permute.xlu0 %633 }
0x1001   :  { %637 = vst.msk [vmem:[#allocation2 + $0x30] sm:$0xff] %vm175_vm5, %v634_v49  ;;  %836 = vmatmul.msk.f32.vlgmr.msra.gmra.mxu2 %vm175_vm5, %v634_v49 }
0x1008   :  { %v710_v50 = vld [vmem:[#allocation2 + $0x30] sm:$0xff] }
0x1009   :  { %844 = vmatmul.msk.f32.gmra.mxu3 %vm175_vm5, %v710_v50 }
0x1084   :  { %v657_v52 = vpop.f32.mrf.mxu2 }
0x1085   :  { %v660_v53 = vadd.f32 %v657_v52, %v169_v51 }
0x1087   :  { %924 = vtanh.f32 %v660_v53  ;;  %v837_v57 = vmul.f32 -1.442695, %v660_v53 }
0x1089   :  { %926 = vpow2.f32 %v837_v57 }
0x108c   :  { %v779_v54 = vpop.f32.mrf.mxu3 }
0x108d   :  { %v925_v55 = vpop.eup %924  ;;  %v780_v56 = vadd.f32 %v1230_v45, %v779_v54 }
0x108e   :  { %683 = vrot.lane.b32.xlu1 %v925_v55, %s1067_s17 }
0x108f   :  { %792 = vst.msk [vmem:[#allocation11 + $0x30] sm:$0xff] %vm785_vm0, %v780_v56  ;;  %v927_v58 = vpop.eup %926 }
0x1090   :  { %v664_v59 = vadd.f32 1.0, %v927_v58 }
0x1092   :  { %928 = vrcp.f32 %v664_v59  ;;  %v676_v63 = vand.u32 2147483648, %v664_v59  ;;  %vm670_vm2 = vweird.f32 %v664_v59  ;;  %v674_v0 = vand.u32 2147483647, %v664_v59 }
0x1094   :  { %v677_v3 = vor.u32 1.1754944e-38, %v676_v63  ;;  %vm675_vm4 = vcmp.eq.f32.partialorder %v674_v0, 8.507059e+37 }
0x1098   :  { %v929_v60 = vpop.eup %928 }
0x1099   :  { %v666_v61 = vmul.f32 %v929_v60, %v664_v59  ;;  %vm671_vm1 = vweird.f32 %v929_v60 }
0x109a   :  { %vm672_vm3 = vmor %vm670_vm2, %vm671_vm1 }
0x109b   :  { %v667_v62 = vsub.f32 1.0, %v666_v61 }
0x109d   :  { %v668_v12 = vmul.f32 %v929_v60, %v667_v62 }
0x109f   :  { %v669_v44 = vadd.f32 %v929_v60, %v668_v12 }
0x10a1   :  { %v673_v1 = vsel %vm672_vm3, %v929_v60, %v669_v44 }
0x10a2   :  { %v678_v8 = vsel %vm675_vm4, %v677_v3, %v673_v1 }
0x10a3   :  { %v681_v10 = vmul.f32 %v678_v8, %v625_v42 }
0x1100   :  { %v684_v6 = vpop.permute.xlu1 %683 }
0x1101   :  { %v686_v9 = vmul.f32 %v684_v6, %v678_v8 }
0x1103   :  { %688 = vrot.lane.b32.xlu2 %v686_v9, %s1068_s3 }
0x115d   :  { %v689_v11 = vpop.permute.xlu2 %688 }
0x115e   :  { %v691_v13 = vadd.f32 %v689_v11, %v681_v10 }
0x1160   :  { %930 = vtanh.f32 %v691_v13 }
0x1166   :  { %v931_v14 = vpop.eup %930 }
0x1167   :  { %694 = vrot.lane.b32.xlu0 %v931_v14, %s1067_s17 }
0x11d9   :  { %v695_v15 = vpop.permute.xlu0 %694 }
0x11da   :  { %v697_v16 = vmul.f32 %v695_v15, %v678_v8 }
0x11dc   :  { %699 = vrot.lane.b32.xlu1 %v697_v16, %s1068_s3 }
0x124e   :  { %v700_v17 = vpop.permute.xlu1 %699 }
0x124f   :  { %703 = vst.msk [vmem:[#allocation2 + $0x38] sm:$0xff] %vm175_vm5, %v700_v17 }
0x1256   :  { %v711_v18 = vld [vmem:[#allocation2 + $0x38] sm:$0xff] }
0x1257   :  { %845 = vmatmul.msk.f32.gmra.mxu3 %vm175_vm5, %v711_v18 }
0x12da   :  { %v782_v19 = vpop.f32.mrf.mxu3 }
0x12db   :  { %v783_v20 = vadd.f32 %v1230_v45, %v782_v19 }
0x12dd   :  { %793 = vst.msk [vmem:[#allocation11 + $0x38] sm:$0xff] %vm785_vm0, %v783_v20 }
0x12de   :  { %806 = dma.vmem_to_hbm [thread:$0]  %s799_s20, 1024, %s801_s23, [#allocation5], %s1061_s29, %s1061_s29, %s1062_s30  }
0x12df   :  { %1058 = dma.done.wait [#allocation5], 1024  }
0x12e0   :  { %1059 = vsyncadd [#allocation5], 4294966272 }
0x12e1   :  { %811 = vsyncpa [#allocation4], 1 }
0x12e2   :  { %812 = vsyncpa [#allocation7], 1 }
0x12e3   :  { %813 = vsyncpa [#allocation10], 1 }
0x12e4   :  { %814 = vsyncpa [#allocation5], 1 }

</bundles_post_ra>
